<compile_context>
chip_gen: v5e
topology: v5e:2x2
jax: 0.10.0
libtpu: 0.0.40
codegen_flags: <defaults>
</compile_context>

<pallas_src>
import functools

import jax
import jax.numpy as jnp
from jax.experimental import pallas as pl
from jax.experimental.pallas import tpu as pltpu


# ---------------------------------------------------------------------------
# Fused kernel: one grid step == one batch element, all heads processed inside.
# ---------------------------------------------------------------------------
def _fused_attention_kernel(x_ref, wqkv_ref, wout_ref, bout_ref, o_ref, *,
                            heads, dim_head):
    """x_ref: (1, n, dim); wqkv_ref: (dim, 3*inner) with Q columns pre-scaled;
    wout_ref: (inner, dim); bout_ref: (1, dim); o_ref: (1, n, dim)."""
    n = x_ref.shape[1]
    dim = x_ref.shape[2]
    inner = heads * dim_head

    x = x_ref[0]                                                     # (n, dim)

    # QKV projection (bias-free), f32 MXU accumulation. Result stays in VMEM.
    qkv = jnp.dot(x, wqkv_ref[...], preferred_element_type=jnp.float32)  # (n, 3*inner)

    # Per-head attention with the output projection folded into the head loop.
    acc = jnp.zeros((n, dim), jnp.float32)
    for h in range(heads):               # static unroll; heads is small & fixed
        lo = h * dim_head
        q = qkv[:, lo:lo + dim_head]                                  # (n, d), pre-scaled
        k = qkv[:, inner + lo:inner + lo + dim_head]                  # (n, d)
        v = qkv[:, 2 * inner + lo:2 * inner + lo + dim_head]          # (n, d)

        # q @ k^T without an explicit transpose: contract last dims directly.
        dots = jax.lax.dot_general(
            q, k, dimension_numbers=(((1,), (1,)), ((), ())),
            preferred_element_type=jnp.float32)                       # (n, n)

        # Max-shifted softmax, f32 math (required on v5e: no bf16 VPU/EUP).
        dots = dots - jnp.max(dots, axis=-1, keepdims=True)
        p = jnp.exp(dots)
        p = p * pl.reciprocal(jnp.sum(p, axis=-1, keepdims=True), approx=True)

        out_h = jnp.dot(p, v, preferred_element_type=jnp.float32)     # (n, d)

        # out @ W_out == sum_h out_h @ W_out[h*d:(h+1)*d, :]  (no concat needed)
        acc = acc + jnp.dot(out_h, wout_ref[lo:lo + dim_head, :],
                            preferred_element_type=jnp.float32)

    o_ref[0] = (acc + bout_ref[...]).astype(o_ref.dtype)


# ---------------------------------------------------------------------------
# Wrapper: one pallas_call for the whole forward.
# ---------------------------------------------------------------------------
def attention_forward(x, params, heads, dim_head):
    b, n, dim = x.shape
    inner = heads * dim_head

    w_qkv = params["w_qkv"]   # (dim, 3*inner), Q columns already scaled by dim_head**-0.5
    w_out = params["w_out"]   # (inner, dim)
    b_out = params["b_out"]   # (1, dim)

    kernel = functools.partial(_fused_attention_kernel,
                               heads=heads, dim_head=dim_head)

    return pl.pallas_call(
        kernel,
        out_shape=jax.ShapeDtypeStruct((b, n, dim), jnp.float32),
        grid=(b,),
        in_specs=[
            pl.BlockSpec((1, n, dim), lambda bi: (bi, 0, 0)),
            # Weights: constant block index -> fetched once, VMEM-resident.
            pl.BlockSpec((dim, 3 * inner), lambda bi: (0, 0)),
            pl.BlockSpec((inner, dim), lambda bi: (0, 0)),
            pl.BlockSpec((1, dim), lambda bi: (0, 0)),
        ],
        out_specs=pl.BlockSpec((1, n, dim), lambda bi: (bi, 0, 0)),
        compiler_params=pltpu.CompilerParams(
            dimension_semantics=("parallel",),   # lets v7x shard batch across both TCs
        ),
    )(x, w_qkv, w_out, b_out)


# ---------------------------------------------------------------------------
# Parameter prep: fold the attention scale into W_qkv's Q columns (done once).
# ---------------------------------------------------------------------------
def prepare_params(raw, heads, dim_head):
    inner = heads * dim_head
    scale = dim_head ** (-0.5)
    w_qkv = raw["w_qkv"].at[:, :inner].multiply(scale)
    return {"w_qkv": w_qkv, "w_out": raw["w_out"], "b_out": raw["b_out"]}


if __name__ == "__main__":
    # Small shapes consistent with the module: batch=2, seq=8, dim=32,
    # heads=4, dim_head=128 (module defaults) -> inner_dim=512.
    batch, seq, dim = 2, 8, 32
    heads, dim_head = 4, 128
    inner = heads * dim_head

    key = jax.random.PRNGKey(0)
    kx, k1, k2, k3 = jax.random.split(key, 4)
    x = jax.random.normal(kx, (batch, seq, dim), jnp.float32)
    # Raw (PyTorch-equivalent, pre-transposed) weights.
    w_qkv_raw = jax.random.normal(k1, (dim, 3 * inner), jnp.float32) * 0.02
    w_out = jax.random.normal(k2, (inner, dim), jnp.float32) * 0.02
    b_out = jax.random.normal(k3, (1, dim), jnp.float32) * 0.02

    params = prepare_params(
        {"w_qkv": w_qkv_raw, "w_out": w_out, "b_out": b_out}, heads, dim_head)

    y = attention_forward(x, params, heads, dim_head)
    y = jax.block_until_ready(y)

    # Pure-JAX reference of the original module math (uses the UNscaled weights
    # and applies the scale explicitly, validating the fold).
    def ref(x):
        qkv = x.reshape(batch * seq, dim) @ w_qkv_raw
        qkv = qkv.reshape(batch, seq, 3 * inner)

        def split(i):
            t = qkv[:, :, i * inner:(i + 1) * inner]
            return t.reshape(batch, seq, heads, dim_head).transpose(0, 2, 1, 3)

        q, k, v = split(0), split(1), split(2)
        dots = jnp.einsum("bhid,bhjd->bhij", q, k) * dim_head ** (-0.5)
        attn = jax.nn.softmax(dots, axis=-1)
        o = jnp.einsum("bhij,bhjd->bhid", attn, v)
        o = o.transpose(0, 2, 1, 3).reshape(batch * seq, inner)
        return (o @ w_out + b_out).reshape(batch, seq, dim)

    ref_y = ref(x)
    max_err = float(jnp.max(jnp.abs(y - ref_y)))
    # Tolerance slightly relaxed vs. exact f32 because of the EUP approximate
    # reciprocal in the softmax denominator (bounded ~1e-4 relative error).
    assert jnp.allclose(y, ref_y, atol=2e-3, rtol=2e-3), max_err
    print("KERNEL_OK")
</pallas_src>

<mosaic_0001>
module attributes {stable_mosaic.version = 11 : i64} {
  func.func @_fused_attention_kernel(%arg0: i32, %arg1: memref<1x8x32xf32, #tpu.memory_space<vmem>>, %arg2: memref<32x1536xf32, #tpu.memory_space<vmem>>, %arg3: memref<512x32xf32, #tpu.memory_space<vmem>>, %arg4: memref<1x32xf32, #tpu.memory_space<vmem>>, %arg5: memref<1x8x32xf32, #tpu.memory_space<vmem>>) attributes {dimension_semantics = [#tpu.dimension_semantics<parallel>], iteration_bounds = array<i64: 2>, scalar_prefetch = 0 : i64, scratch_operands = 0 : i64, tpu.core_type = #tpu.core_type<tc>, window_params = [{transform_indices = @transform_0, window_bounds = array<i64: 1, 8, 32>}, {pipeline_mode = #tpu.pipeline_mode<synchronous>, transform_indices = @transform_1, window_bounds = array<i64: 32, 1536>}, {pipeline_mode = #tpu.pipeline_mode<synchronous>, transform_indices = @transform_2, window_bounds = array<i64: 512, 32>}, {pipeline_mode = #tpu.pipeline_mode<synchronous>, transform_indices = @transform_3, window_bounds = array<i64: 1, 32>}, {transform_indices = @transform_4, window_bounds = array<i64: 1, 8, 32>}]} {
    %c0 = arith.constant 0 : index
    %c0_0 = arith.constant 0 : index
    %c0_1 = arith.constant 0 : index
    %0 = vector.load %arg1[%c0, %c0_0, %c0_1] : memref<1x8x32xf32, #tpu.memory_space<vmem>>, vector<1x8x32xf32>
    %1 = vector.shape_cast %0 : vector<1x8x32xf32> to vector<8x32xf32>
    %c0_2 = arith.constant 0 : index
    %c0_3 = arith.constant 0 : index
    %2 = vector.load %arg2[%c0_2, %c0_3] : memref<32x1536xf32, #tpu.memory_space<vmem>>, vector<32x1536xf32>
    %cst = arith.constant dense<0.000000e+00> : vector<8x1536xf32>
    %3 = tpu.matmul %1, %2, %cst {dimension_numbers = #tpu.dot_dimension_numbers<[1], [0], [0], [1], [0, 0, 1, 1], [], []>} : vector<8x32xf32>, vector<32x1536xf32>, vector<8x1536xf32> -> vector<8x1536xf32>
    %cst_4 = arith.constant 0.000000e+00 : f32
    %4 = vector.broadcast %cst_4 : f32 to vector<8x32xf32>
    %5 = vector.extract_strided_slice %3 {offsets = [0, 0], sizes = [8, 128], strides = [1, 1]} : vector<8x1536xf32> to vector<8x128xf32>
    %6 = vector.extract_strided_slice %3 {offsets = [0, 512], sizes = [8, 128], strides = [1, 1]} : vector<8x1536xf32> to vector<8x128xf32>
    %7 = vector.extract_strided_slice %3 {offsets = [0, 1024], sizes = [8, 128], strides = [1, 1]} : vector<8x1536xf32> to vector<8x128xf32>
    %cst_5 = arith.constant dense<0.000000e+00> : vector<8x8xf32>
    %8 = tpu.matmul %5, %6, %cst_5 {dimension_numbers = #tpu.dot_dimension_numbers<[1], [1], [0], [0], [0, 0, 1, 0], [], []>} : vector<8x128xf32>, vector<8x128xf32>, vector<8x8xf32> -> vector<8x8xf32>
    %cst_6 = arith.constant dense<0xFF800000> : vector<8xf32>
    %9 = vector.multi_reduction <maximumf>, %8, %cst_6 [1] : vector<8x8xf32> to vector<8xf32>
    %10 = vector.shape_cast %9 : vector<8xf32> to vector<8x1xf32>
    %11 = vector.broadcast %10 : vector<8x1xf32> to vector<8x8xf32>
    %12 = arith.subf %8, %11 : vector<8x8xf32>
    %13 = math.exp %12 : vector<8x8xf32>
    %cst_7 = arith.constant dense<0.000000e+00> : vector<8xf32>
    %14 = vector.multi_reduction <add>, %13, %cst_7 [1] : vector<8x8xf32> to vector<8xf32>
    %15 = vector.shape_cast %14 : vector<8xf32> to vector<8x1xf32>
    %16 = tpu.reciprocal %15 {approx = true} : vector<8x1xf32> -> vector<8x1xf32>
    %17 = vector.broadcast %16 : vector<8x1xf32> to vector<8x8xf32>
    %18 = arith.mulf %13, %17 : vector<8x8xf32>
    %cst_8 = arith.constant dense<0.000000e+00> : vector<8x128xf32>
    %19 = tpu.matmul %18, %7, %cst_8 {dimension_numbers = #tpu.dot_dimension_numbers<[1], [0], [0], [1], [0, 0, 1, 1], [], []>} : vector<8x8xf32>, vector<8x128xf32>, vector<8x128xf32> -> vector<8x128xf32>
    %c0_9 = arith.constant 0 : index
    %c0_10 = arith.constant 0 : index
    %20 = vector.load %arg3[%c0_9, %c0_10] : memref<512x32xf32, #tpu.memory_space<vmem>>, vector<128x32xf32>
    %cst_11 = arith.constant dense<0.000000e+00> : vector<8x32xf32>
    %21 = tpu.matmul %19, %20, %cst_11 {dimension_numbers = #tpu.dot_dimension_numbers<[1], [0], [0], [1], [0, 0, 1, 1], [], []>} : vector<8x128xf32>, vector<128x32xf32>, vector<8x32xf32> -> vector<8x32xf32>
    %22 = arith.addf %4, %21 : vector<8x32xf32>
    %23 = vector.extract_strided_slice %3 {offsets = [0, 128], sizes = [8, 128], strides = [1, 1]} : vector<8x1536xf32> to vector<8x128xf32>
    %24 = vector.extract_strided_slice %3 {offsets = [0, 640], sizes = [8, 128], strides = [1, 1]} : vector<8x1536xf32> to vector<8x128xf32>
    %25 = vector.extract_strided_slice %3 {offsets = [0, 1152], sizes = [8, 128], strides = [1, 1]} : vector<8x1536xf32> to vector<8x128xf32>
    %cst_12 = arith.constant dense<0.000000e+00> : vector<8x8xf32>
    %26 = tpu.matmul %23, %24, %cst_12 {dimension_numbers = #tpu.dot_dimension_numbers<[1], [1], [0], [0], [0, 0, 1, 0], [], []>} : vector<8x128xf32>, vector<8x128xf32>, vector<8x8xf32> -> vector<8x8xf32>
    %cst_13 = arith.constant dense<0xFF800000> : vector<8xf32>
    %27 = vector.multi_reduction <maximumf>, %26, %cst_13 [1] : vector<8x8xf32> to vector<8xf32>
    %28 = vector.shape_cast %27 : vector<8xf32> to vector<8x1xf32>
    %29 = vector.broadcast %28 : vector<8x1xf32> to vector<8x8xf32>
    %30 = arith.subf %26, %29 : vector<8x8xf32>
    %31 = math.exp %30 : vector<8x8xf32>
    %cst_14 = arith.constant dense<0.000000e+00> : vector<8xf32>
    %32 = vector.multi_reduction <add>, %31, %cst_14 [1] : vector<8x8xf32> to vector<8xf32>
    %33 = vector.shape_cast %32 : vector<8xf32> to vector<8x1xf32>
    %34 = tpu.reciprocal %33 {approx = true} : vector<8x1xf32> -> vector<8x1xf32>
    %35 = vector.broadcast %34 : vector<8x1xf32> to vector<8x8xf32>
    %36 = arith.mulf %31, %35 : vector<8x8xf32>
    %cst_15 = arith.constant dense<0.000000e+00> : vector<8x128xf32>
    %37 = tpu.matmul %36, %25, %cst_15 {dimension_numbers = #tpu.dot_dimension_numbers<[1], [0], [0], [1], [0, 0, 1, 1], [], []>} : vector<8x8xf32>, vector<8x128xf32>, vector<8x128xf32> -> vector<8x128xf32>
    %c128 = arith.constant 128 : index
    %c0_16 = arith.constant 0 : index
    %38 = vector.load %arg3[%c128, %c0_16] : memref<512x32xf32, #tpu.memory_space<vmem>>, vector<128x32xf32>
    %cst_17 = arith.constant dense<0.000000e+00> : vector<8x32xf32>
    %39 = tpu.matmul %37, %38, %cst_17 {dimension_numbers = #tpu.dot_dimension_numbers<[1], [0], [0], [1], [0, 0, 1, 1], [], []>} : vector<8x128xf32>, vector<128x32xf32>, vector<8x32xf32> -> vector<8x32xf32>
    %40 = arith.addf %22, %39 : vector<8x32xf32>
    %41 = vector.extract_strided_slice %3 {offsets = [0, 256], sizes = [8, 128], strides = [1, 1]} : vector<8x1536xf32> to vector<8x128xf32>
    %42 = vector.extract_strided_slice %3 {offsets = [0, 768], sizes = [8, 128], strides = [1, 1]} : vector<8x1536xf32> to vector<8x128xf32>
    %43 = vector.extract_strided_slice %3 {offsets = [0, 1280], sizes = [8, 128], strides = [1, 1]} : vector<8x1536xf32> to vector<8x128xf32>
    %cst_18 = arith.constant dense<0.000000e+00> : vector<8x8xf32>
    %44 = tpu.matmul %41, %42, %cst_18 {dimension_numbers = #tpu.dot_dimension_numbers<[1], [1], [0], [0], [0, 0, 1, 0], [], []>} : vector<8x128xf32>, vector<8x128xf32>, vector<8x8xf32> -> vector<8x8xf32>
    %cst_19 = arith.constant dense<0xFF800000> : vector<8xf32>
    %45 = vector.multi_reduction <maximumf>, %44, %cst_19 [1] : vector<8x8xf32> to vector<8xf32>
    %46 = vector.shape_cast %45 : vector<8xf32> to vector<8x1xf32>
    %47 = vector.broadcast %46 : vector<8x1xf32> to vector<8x8xf32>
    %48 = arith.subf %44, %47 : vector<8x8xf32>
    %49 = math.exp %48 : vector<8x8xf32>
    %cst_20 = arith.constant dense<0.000000e+00> : vector<8xf32>
    %50 = vector.multi_reduction <add>, %49, %cst_20 [1] : vector<8x8xf32> to vector<8xf32>
    %51 = vector.shape_cast %50 : vector<8xf32> to vector<8x1xf32>
    %52 = tpu.reciprocal %51 {approx = true} : vector<8x1xf32> -> vector<8x1xf32>
    %53 = vector.broadcast %52 : vector<8x1xf32> to vector<8x8xf32>
    %54 = arith.mulf %49, %53 : vector<8x8xf32>
    %cst_21 = arith.constant dense<0.000000e+00> : vector<8x128xf32>
    %55 = tpu.matmul %54, %43, %cst_21 {dimension_numbers = #tpu.dot_dimension_numbers<[1], [0], [0], [1], [0, 0, 1, 1], [], []>} : vector<8x8xf32>, vector<8x128xf32>, vector<8x128xf32> -> vector<8x128xf32>
    %c256 = arith.constant 256 : index
    %c0_22 = arith.constant 0 : index
    %56 = vector.load %arg3[%c256, %c0_22] : memref<512x32xf32, #tpu.memory_space<vmem>>, vector<128x32xf32>
    %cst_23 = arith.constant dense<0.000000e+00> : vector<8x32xf32>
    %57 = tpu.matmul %55, %56, %cst_23 {dimension_numbers = #tpu.dot_dimension_numbers<[1], [0], [0], [1], [0, 0, 1, 1], [], []>} : vector<8x128xf32>, vector<128x32xf32>, vector<8x32xf32> -> vector<8x32xf32>
    %58 = arith.addf %40, %57 : vector<8x32xf32>
    %59 = vector.extract_strided_slice %3 {offsets = [0, 384], sizes = [8, 128], strides = [1, 1]} : vector<8x1536xf32> to vector<8x128xf32>
    %60 = vector.extract_strided_slice %3 {offsets = [0, 896], sizes = [8, 128], strides = [1, 1]} : vector<8x1536xf32> to vector<8x128xf32>
    %61 = vector.extract_strided_slice %3 {offsets = [0, 1408], sizes = [8, 128], strides = [1, 1]} : vector<8x1536xf32> to vector<8x128xf32>
    %cst_24 = arith.constant dense<0.000000e+00> : vector<8x8xf32>
    %62 = tpu.matmul %59, %60, %cst_24 {dimension_numbers = #tpu.dot_dimension_numbers<[1], [1], [0], [0], [0, 0, 1, 0], [], []>} : vector<8x128xf32>, vector<8x128xf32>, vector<8x8xf32> -> vector<8x8xf32>
    %cst_25 = arith.constant dense<0xFF800000> : vector<8xf32>
    %63 = vector.multi_reduction <maximumf>, %62, %cst_25 [1] : vector<8x8xf32> to vector<8xf32>
    %64 = vector.shape_cast %63 : vector<8xf32> to vector<8x1xf32>
    %65 = vector.broadcast %64 : vector<8x1xf32> to vector<8x8xf32>
    %66 = arith.subf %62, %65 : vector<8x8xf32>
    %67 = math.exp %66 : vector<8x8xf32>
    %cst_26 = arith.constant dense<0.000000e+00> : vector<8xf32>
    %68 = vector.multi_reduction <add>, %67, %cst_26 [1] : vector<8x8xf32> to vector<8xf32>
    %69 = vector.shape_cast %68 : vector<8xf32> to vector<8x1xf32>
    %70 = tpu.reciprocal %69 {approx = true} : vector<8x1xf32> -> vector<8x1xf32>
    %71 = vector.broadcast %70 : vector<8x1xf32> to vector<8x8xf32>
    %72 = arith.mulf %67, %71 : vector<8x8xf32>
    %cst_27 = arith.constant dense<0.000000e+00> : vector<8x128xf32>
    %73 = tpu.matmul %72, %61, %cst_27 {dimension_numbers = #tpu.dot_dimension_numbers<[1], [0], [0], [1], [0, 0, 1, 1], [], []>} : vector<8x8xf32>, vector<8x128xf32>, vector<8x128xf32> -> vector<8x128xf32>
    %c384 = arith.constant 384 : index
    %c0_28 = arith.constant 0 : index
    %74 = vector.load %arg3[%c384, %c0_28] : memref<512x32xf32, #tpu.memory_space<vmem>>, vector<128x32xf32>
    %cst_29 = arith.constant dense<0.000000e+00> : vector<8x32xf32>
    %75 = tpu.matmul %73, %74, %cst_29 {dimension_numbers = #tpu.dot_dimension_numbers<[1], [0], [0], [1], [0, 0, 1, 1], [], []>} : vector<8x128xf32>, vector<128x32xf32>, vector<8x32xf32> -> vector<8x32xf32>
    %76 = arith.addf %58, %75 : vector<8x32xf32>
    %c0_30 = arith.constant 0 : index
    %c0_31 = arith.constant 0 : index
    %77 = vector.load %arg4[%c0_30, %c0_31] : memref<1x32xf32, #tpu.memory_space<vmem>>, vector<1x32xf32>
    %78 = vector.broadcast %77 : vector<1x32xf32> to vector<8x32xf32>
    %79 = arith.addf %76, %78 : vector<8x32xf32>
    %c0_32 = arith.constant 0 : index
    %c0_33 = arith.constant 0 : index
    %c0_34 = arith.constant 0 : index
    %80 = vector.load %arg5[%c0_32, %c0_33, %c0_34] : memref<1x8x32xf32, #tpu.memory_space<vmem>>, vector<1x8x32xf32>
    %81 = vector.shape_cast %80 : vector<1x8x32xf32> to vector<8x32xf32>
    %82 = vector.shape_cast %79 : vector<8x32xf32> to vector<1x8x32xf32>
    tpu.vector_store %arg5[%c0_32, %c0_33, %c0_34], %82 {strides = array<i32>} : memref<1x8x32xf32, #tpu.memory_space<vmem>>, vector<1x8x32xf32>,
    return
  }
  func.func @transform_0(%arg0: i32) -> (i32, i32, i32) {
    %c0_i32 = arith.constant 0 : i32
    %c0_i32_0 = arith.constant 0 : i32
    %c0_i32_1 = arith.constant 0 : i32
    return %arg0, %c0_i32, %c0_i32_0 : i32, i32, i32
  }
  func.func @transform_1(%arg0: i32) -> (i32, i32) {
    %c0_i32 = arith.constant 0 : i32
    %c0_i32_0 = arith.constant 0 : i32
    %c0_i32_1 = arith.constant 0 : i32
    return %c0_i32, %c0_i32_0 : i32, i32
  }
  func.func @transform_2(%arg0: i32) -> (i32, i32) {
    %c0_i32 = arith.constant 0 : i32
    %c0_i32_0 = arith.constant 0 : i32
    %c0_i32_1 = arith.constant 0 : i32
    return %c0_i32, %c0_i32_0 : i32, i32
  }
  func.func @transform_3(%arg0: i32) -> (i32, i32) {
    %c0_i32 = arith.constant 0 : i32
    %c0_i32_0 = arith.constant 0 : i32
    %c0_i32_1 = arith.constant 0 : i32
    return %c0_i32, %c0_i32_0 : i32, i32
  }
  func.func @transform_4(%arg0: i32) -> (i32, i32, i32) {
    %c0_i32 = arith.constant 0 : i32
    %c0_i32_0 = arith.constant 0 : i32
    %c0_i32_1 = arith.constant 0 : i32
    return %arg0, %c0_i32, %c0_i32_0 : i32, i32, i32
  }
}

</mosaic_0001>

<bundles_post_ra>
// kernel: tpu_custom_call.1
= control target key start
LH: loop header
LB: loop body
LE: loop exit
PB: predicated region body
PF: predicated region fallthrough
CT: control target
= control target key end

     0   :  { %9 = vsyncpa [#allocation3], 0  ;;  %s1578_s0 = inlined_call_operand.vmem [shape: f32[2,8,32], index: 0, kind: input, shape index: {}]   ;;  %s1579_s1 = inlined_call_operand.vmem [shape: f32[32,1536], index: 1, kind: input, shape index: {}]   ;;  %s1580_s2 = inlined_call_operand.vmem [shape: f32[512,32], index: 2, kind: input, shape index: {}]   ;;  %s1581_s3 = inlined_call_operand.vmem [shape: f32[1,32], index: 3, kind: input, shape index: {}]   ;;  %s1582_s4 = inlined_call_operand.hbm [shape: f32[2,8,32], index: 4, kind: output, shape index: {}]  }
   0x1   :  { %11 = vsyncpa [#allocation3 + $0x1], 0  ;;  %s1101_s15 = smov 0   ;;  %s1103_s16 = smov 0  }
   0x2   :  { %s1105_s17 = smov 0   ;;  %s1107_s18 = smov 0  }
   0x3 LB: > { %s1122_s19 = sadd.s32 4294967295, %s1074_s18   ;;  %s930_s20 = sadd.s32 4294967294, %s1074_s18   ;;  %s1074_s18 = sphi %s1107_s18, %s1588_s18   ;;  %s1070_s17 = sphi %s1105_s17, %s1587_s17   ;;  %s1066_s16 = sphi %s1103_s16, %s1586_s16   ;;  %s1062_s15 = sphi %s1101_s15, %s1585_s15  }
   0x4   : > { %s1126_s21 = sadd.s32 1, %s1074_s18   ;;  %s113_s22 = sadd.s32 1, %s1070_s17 }
   0x5   : > { %s110_s23 = ssub.s32 %s1074_s18, %s1126_s21  ;;  %p123_p0 = scmp.ne.s32.totalorder %s1070_s17, %s1066_s16 }
   0x6   : > { %p111_p1 = scmp.eq.s32.totalorder %s110_s23, 0  ;;  %p124_p2 = scmp.eq.s32.totalorder %s1122_s19, 1 }
   0x7   : > { %p129_p3 = scmp.ne.s32.totalorder %s1066_s16, %s1062_s15  ;;  %p130_p4 = scmp.eq.s32.totalorder %s930_s20, 1 }
   0x8   : > { %s1137_s24 = scalar_select %p111_p1, %s1070_s17, %s113_s22  }
   0x9   : > { %p1139_p5 = por %p124_p2, %p123_p0  ;;  %p1143_p6 = por %p130_p4, %p129_p3 }
   0xa   : > { %p933_p7 = scmp.ge.s32.totalorder %s1074_s18, 1  ;;  %p164_p8 = scmp.lt.s32.totalorder %s1074_s18, 3 }
   0xc   : > { %p165_p9 = pnand %p933_p7, %p164_p8 }
   0xd   : > { %p189_p10 = scmp.lt.s32.totalorder (!%p165_p9), %s1122_s19, 1  ;;  %s186_s9 = sand.u32 (!%p165_p9), 1, %s1066_s16  }
   0xe   : > { %168 = sbr.rel (%p165_p9) target bundleno = 1223 (0x4c7), region = 36  ;;  %s934_s10 = sshll.u32 (!%p165_p9), %s186_s9, 3 }
   0xf   : > { %s953_s11 = sshll.u32 (!%p165_p9), %s1122_s19, 3  ;;  %s188_s23 = scalar_lea.vmem (!%p165_p9), [#allocation2], %s934_s10 }
  0x10   : > { %s866_s14 = scalar_lea.hbm (!%p165_p9), %s1582_s4, %s953_s11  ;;  %s868_s27 = sshll.u32 (!%p165_p9), %s188_s23, 4  ;;  %s869_s27 = int_to_ptr.vmem [resolvable:$true] %s868_s27 }
  0x11   : > { %s870_s28 = sshll.u32 (!%p165_p9), %s866_s14, 4  ;;  %s1032_s7 = scalar_lea.hbm (!%p165_p9), %s1582_s4, 16  ;;  %s871_s28 = int_to_ptr.hbm [resolvable:$true] %s870_s28 }
  0x12   : > { %s1026_s29 = sshra.s32 (!%p165_p9), %s871_s28, 4  ;;  %s1027_s29 = int_to_ptr.hbm [resolvable:$true] %s1026_s29 }
  0x13   : > { %v231_v0 = vld [vmem:[%s1579_s1 + $0x128] sm:$0xff]  ;;  %v232_v2 = vld [vmem:[%s1579_s1 + $0x130] sm:$0xff]  ;;  %s190_s13 = scalar_select %p189_p10, %s1122_s19, 1  ;;  %vm242_vm0 = vcmask 261120   ;;  %v237_v18 = vld [vmem:[%s1579_s1 + $0x158] sm:$0xff]  ;;  %vm506_vm1 = vcmask 64512  }
  0x14   : > { %v219_v1 = vld [vmem:[%s1579_s1 + $0xc8] sm:$0xff]  ;;  %278 = vmatpush.msra.mxu1 %v231_v0  ;;  %298 = vmatpush.msra.mxu2 %v232_v2  ;;  %v220_v3 = vld [vmem:[%s1579_s1 + $0xd0] sm:$0xff]  ;;  %v225_v20 = vld [vmem:[%s1579_s1 + $0xf8] sm:$0xff]  ;;  %s856_s19 = scalar_lea.sflag [#allocation3], %s186_s9  ;;  %p1033_p0 = scmp.lt.s32.totalorder %s1027_s29, %s1582_s4 }
  0x15   : > { %v207_v4 = vld [vmem:[%s1579_s1 + $0x68] sm:$0xff]  ;;  %v208_v5 = vld [vmem:[%s1579_s1 + $0x70] sm:$0xff]  ;;  %s935_s22 = sshll.u32 %s190_s13, 3  ;;  %v213_v21 = vld [vmem:[%s1579_s1 + $0x98] sm:$0xff] }
  0x16   : > { %279 = vmatpush.msra.mxu1 %v219_v1  ;;  %299 = vmatpush.msra.mxu2 %v220_v3  ;;  %v195_v6 = vld [vmem:[%s1579_s1 + $0x8] sm:$0xff]  ;;  %v196_v7 = vld [vmem:[%s1579_s1 + $0x10] sm:$0xff]  ;;  %s192_s30 = scalar_lea.vmem %s1578_s0, %s935_s22  ;;  %v201_v22 = vld [vmem:[%s1579_s1 + $0x38] sm:$0xff] }
  0x17   : > { %v235_v8 = vld [vmem:[%s1579_s1 + $0x148] sm:$0xff]  ;;  %v1181_v9 = vld [vmem:[%s192_s30] sm:$0xff]  ;;  %v236_v10 = vld [vmem:[%s1579_s1 + $0x150] sm:$0xff]  ;;  %s1028_s30 = scalar_lea.hbm %s1027_s29, 8 }
  0x18   : > { %280 = vmatpush.msra.mxu1 %v207_v4  ;;  %300 = vmatpush.msra.mxu2 %v208_v5  ;;  %v223_v11 = vld [vmem:[%s1579_s1 + $0xe8] sm:$0xff]  ;;  %v224_v12 = vld [vmem:[%s1579_s1 + $0xf0] sm:$0xff]  ;;  %v241_v33 = vld [vmem:[%s1579_s1 + $0x178] sm:$0xff]  ;;  %p1029_p11 = scmp.ne.s32.totalorder %s1027_s29, %s1028_s30  ;;  %p1034_p1 = scmp.lt.s32.totalorder %s1032_s7, %s1028_s30 }
  0x19   : > { %v211_v13 = vld [vmem:[%s1579_s1 + $0x88] sm:$0xff]  ;;  %v212_v14 = vld [vmem:[%s1579_s1 + $0x90] sm:$0xff]  ;;  %478 = vmatpush.msra.mxu3 %v241_v33  ;;  %v229_v34 = vld [vmem:[%s1579_s1 + $0x118] sm:$0xff] }
  0x1a   : > { %281 = vmatpush.msra.mxu1 %v195_v6  ;;  %301 = vmatpush.msra.mxu2 %v196_v7  ;;  %v199_v15 = vld [vmem:[%s1579_s1 + $0x28] sm:$0xff]  ;;  %v200_v16 = vld [vmem:[%s1579_s1 + $0x30] sm:$0xff]  ;;  %v217_v35 = vld [vmem:[%s1579_s1 + $0xb8] sm:$0xff]  ;;  %p1030_p12 = pnand %p1029_p11, %p1139_p5  ;;  %p1035_p2 = por %p1034_p1, %p1033_p0 }
  0x1b   : > { %937 = vmatmul.msk.f32.vlgmr.msra.gmra.mxu1 %vm242_vm0, %v1181_v9  ;;  %938 = vmatmul.msk.f32.vlgmr.msra.gmra.mxu2 %vm242_vm0, %v1181_v9  ;;  %v240_v17 = vld [vmem:[%s1579_s1 + $0x170] sm:$0xff]  ;;  %v239_v25 = vld [vmem:[%s1579_s1 + $0x168] sm:$0xff]  ;;  %v205_v36 = vld [vmem:[%s1579_s1 + $0x58] sm:$0xff] }
  0x1c   : > { %358 = vmatpush.msrb.mxu1 %v235_v8  ;;  %378 = vmatpush.msrb.mxu2 %v236_v10  ;;  %v228_v19 = vld [vmem:[%s1579_s1 + $0x110] sm:$0xff]  ;;  %v227_v26 = vld [vmem:[%s1579_s1 + $0x108] sm:$0xff]  ;;  %v230_v40 = vld [vmem:[%s1579_s1 + $0x120] sm:$0xff]  ;;  %p1031_p13 = pneg %p1030_p12 }
  0x1d   : > { %v216_v23 = vld [vmem:[%s1579_s1 + $0xb0] sm:$0xff]  ;;  %v215_v27 = vld [vmem:[%s1579_s1 + $0xa8] sm:$0xff]  ;;  %479 = vmatpush.msra.mxu3 %v229_v34  ;;  %v218_v41 = vld [vmem:[%s1579_s1 + $0xc0] sm:$0xff]  ;;  %258 = vmatpush.msra.mxu0 %v230_v40 }
  0x1e   : > { %359 = vmatpush.msrb.mxu1 %v223_v11  ;;  %379 = vmatpush.msrb.mxu2 %v224_v12  ;;  %v204_v24 = vld [vmem:[%s1579_s1 + $0x50] sm:$0xff]  ;;  %v203_v28 = vld [vmem:[%s1579_s1 + $0x48] sm:$0xff]  ;;  %v206_v46 = vld [vmem:[%s1579_s1 + $0x60] sm:$0xff]  ;;  %p1036_p3 = pnand %p1035_p2, %p1031_p13 }
  0x1f   : > { %480 = vmatpush.msra.mxu3 %v217_v35  ;;  %259 = vmatpush.msra.mxu0 %v218_v41  ;;  %v194_v47 = vld [vmem:[%s1579_s1] sm:$0xff]  ;;  %v233_v48 = vld [vmem:[%s1579_s1 + $0x138] sm:$0xff]  ;;  %v625_v11 = vld [vmem:[%s1580_s2 + $0xf0] sm:$0xff] }
  0x20   : > { %360 = vmatpush.msrb.mxu1 %v211_v13  ;;  %380 = vmatpush.msrb.mxu2 %v212_v14  ;;  %v221_v49 = vld [vmem:[%s1579_s1 + $0xd8] sm:$0xff]  ;;  %v234_v52 = vld [vmem:[%s1579_s1 + $0x140] sm:$0xff]  ;;  %v735_v13 = vld [vmem:[%s1580_s2 + $0x170] sm:$0xff] }
  0x21   : > { %481 = vmatpush.msra.mxu3 %v205_v36  ;;  %260 = vmatpush.msra.mxu0 %v206_v46  ;;  %v209_v50 = vld [vmem:[%s1579_s1 + $0x78] sm:$0xff]  ;;  %v222_v53 = vld [vmem:[%s1579_s1 + $0xe0] sm:$0xff]  ;;  %v734_v14 = vld [vmem:[%s1580_s2 + $0x168] sm:$0xff] }
  0x22   : > { %361 = vmatpush.msrb.mxu1 %v199_v15  ;;  %381 = vmatpush.msrb.mxu2 %v200_v16  ;;  %v197_v51 = vld [vmem:[%s1579_s1 + $0x18] sm:$0xff]  ;;  %v210_v54 = vld [vmem:[%s1579_s1 + $0x80] sm:$0xff]  ;;  %v616_v33 = vld [vmem:[%s1580_s2 + $0xa8] sm:$0xff] }
  0x23   : > { %941 = vmatmul.msk.f32.vlgmr.msrb.gmra.mxu1 %vm242_vm0, %v1181_v9  ;;  %942 = vmatmul.msk.f32.vlgmr.msrb.gmra.mxu2 %vm242_vm0, %v1181_v9  ;;  %v198_v55 = vld [vmem:[%s1579_s1 + $0x20] sm:$0xff]  ;;  %v626_v10 = vld [vmem:[%s1580_s2 + $0xf8] sm:$0xff]  ;;  %v612_v40 = vld [vmem:[%s1580_s2 + $0x88] sm:$0xff] }
  0x24   : > { %458 = vmatpush.msra.mxu2 %v240_v17  ;;  %398 = vmatpush.msra.mxu1 %v237_v18  ;;  %v238_v3 = vld [vmem:[%s1579_s1 + $0x160] sm:$0xff]  ;;  %v736_v12 = vld [vmem:[%s1580_s2 + $0x178] sm:$0xff]  ;;  %v726_v41 = vld [vmem:[%s1580_s2 + $0x128] sm:$0xff] }
  0x25   : > { %947 = vmatmul.msk.f32.vlgmr.msra.gmra.mxu3 %vm242_vm0, %v1181_v9  ;;  %261 = vmatpush.msra.mxu0 %v194_v47  ;;  %v226_v4 = vld [vmem:[%s1579_s1 + $0x100] sm:$0xff]  ;;  %v622_v18 = vld [vmem:[%s1580_s2 + $0xd8] sm:$0xff]  ;;  %v723_v46 = vld [vmem:[%s1580_s2 + $0x110] sm:$0xff] }
  0x26   : > { %459 = vmatpush.msra.mxu2 %v228_v19  ;;  %399 = vmatpush.msra.mxu1 %v225_v20  ;;  %v214_v6 = vld [vmem:[%s1579_s1 + $0xa0] sm:$0xff]  ;;  %v732_v19 = vld [vmem:[%s1580_s2 + $0x158] sm:$0xff]  ;;  %v621_v20 = vld [vmem:[%s1580_s2 + $0xd0] sm:$0xff] }
  0x27   : > { %936 = vmatmul.msk.f32.vlgmr.msra.gmra.mxu0 %vm242_vm0, %v1181_v9  ;;  %v202_v7 = vld [vmem:[%s1579_s1 + $0x40] sm:$0xff]  ;;  %v722_v47 = vld [vmem:[%s1580_s2 + $0x108] sm:$0xff] }
  0x28   : > { %400 = vmatpush.msra.mxu1 %v213_v21  ;;  %460 = vmatpush.msra.mxu2 %v216_v23  ;;  %v623_v15 = vld [vmem:[%s1580_s2 + $0xe0] sm:$0xff]  ;;  %v731_v21 = vld [vmem:[%s1580_s2 + $0x150] sm:$0xff]  ;;  %v730_v23 = vld [vmem:[%s1580_s2 + $0x148] sm:$0xff] }
  0x29   : > { %318 = vmatpush.msrb.mxu0 %v233_v48  ;;  %v733_v16 = vld [vmem:[%s1580_s2 + $0x160] sm:$0xff] }
  0x2a   : > { %401 = vmatpush.msra.mxu1 %v201_v22  ;;  %461 = vmatpush.msra.mxu2 %v204_v24  ;;  %v620_v22 = vld [vmem:[%s1580_s2 + $0xc8] sm:$0xff]  ;;  %v619_v24 = vld [vmem:[%s1580_s2 + $0xc0] sm:$0xff] }
  0x2b   : > { %943 = vmatmul.msk.f32.vlgmr.msra.gmra.mxu1 %vm242_vm0, %v1181_v9  ;;  %946 = vmatmul.msk.f32.vlgmr.msra.gmra.mxu2 %vm242_vm0, %v1181_v9  ;;  %v615_v34 = vld [vmem:[%s1580_s2 + $0xa0] sm:$0xff] }
  0x2c   : > { %438 = vmatpush.msrb.mxu1 %v239_v25  ;;  %319 = vmatpush.msrb.mxu0 %v221_v49  ;;  %v721_v48 = vld [vmem:[%s1580_s2 + $0x100] sm:$0xff] }
  0x2e   : > { %439 = vmatpush.msrb.mxu1 %v227_v26  ;;  %320 = vmatpush.msrb.mxu0 %v209_v50  ;;  %v729_v26 = vld [vmem:[%s1580_s2 + $0x140] sm:$0xff] }
  0x30   : > { %440 = vmatpush.msrb.mxu1 %v215_v27  ;;  %321 = vmatpush.msrb.mxu0 %v197_v51 }
  0x31   : > { %939 = vmatmul.msk.f32.vlgmr.msrb.gmra.mxu0 %vm242_vm0, %v1181_v9 }
  0x32   : > { %441 = vmatpush.msrb.mxu1 %v203_v28  ;;  %338 = vmatpush.msra.mxu0 %v234_v52 }
  0x33   : > { %945 = vmatmul.msk.f32.vlgmr.msrb.gmra.mxu1 %vm242_vm0, %v1181_v9 }
  0x34   : > { %339 = vmatpush.msra.mxu0 %v222_v53 }
  0x36   : > { %340 = vmatpush.msra.mxu0 %v210_v54 }
  0x38   : > { %341 = vmatpush.msra.mxu0 %v198_v55 }
  0x39   : > { %940 = vmatmul.msk.f32.vlgmr.msra.gmra.mxu0 %vm242_vm0, %v1181_v9 }
  0x3a   : > { %418 = vmatpush.msrb.mxu0 %v238_v3  ;;  %v826_v3 = vld [vmem:[%s1580_s2 + $0x1f0] sm:$0xff] }
  0x3c   : > { %419 = vmatpush.msrb.mxu0 %v226_v4  ;;  %v555_v4 = vld [vmem:[%s1580_s2 + $0x70] sm:$0xff] }
  0x3e   : > { %420 = vmatpush.msrb.mxu0 %v214_v6  ;;  %v554_v6 = vld [vmem:[%s1580_s2 + $0x68] sm:$0xff] }
  0x40   : > { %421 = vmatpush.msrb.mxu0 %v202_v7  ;;  %v824_v7 = vld [vmem:[%s1580_s2 + $0x1e0] sm:$0xff] }
  0x41   : > { %944 = vmatmul.msk.f32.vlgmr.msrb.gmra.mxu0 %vm242_vm0, %v1181_v9  ;;  %v624_v9 = vld [vmem:[%s1580_s2 + $0xe8] sm:$0xff] }
  0x98   : > { %v283_v29 = vpop.f32.mrf.mxu1 }
  0x9e   : > { %v303_v30 = vpop.f32.mrf.mxu2 }
  0xa0   : > { %v363_v31 = vpop.f32.mrf.mxu1 }
  0xa1   : > { %572 = vmatpush.xpose.msrb.mxu2 %v363_v31  ;;  %v617_v31 = vld [vmem:[%s1580_s2 + $0xb0] sm:$0xff] }
  0xa4   : > { %573 = vmatmul.f32.vlgmr.msrb.gmra.mxu2 %v283_v29  ;;  %v263_v2 = vpop.f32.mrf.mxu0  ;;  %v618_v29 = vld [vmem:[%s1580_s2 + $0xb8] sm:$0xff] }
  0xa6   : > { %v383_v32 = vpop.f32.mrf.mxu2 }
  0xa7   : > { %682 = vmatpush.xpose.msra.mxu2 %v383_v32  ;;  %v727_v32 = vld [vmem:[%s1580_s2 + $0x130] sm:$0xff] }
  0xa8   : > { %v1268_v37 = vpop.f32.mrf.mxu1 }
  0xab   : > { %737 = vmatpush.msrb.mxu2 %v736_v12  ;;  %v822_v12 = vld [vmem:[%s1580_s2 + $0x1d0] sm:$0xff] }
  0xac   : > { %683 = vmatmul.f32.vlgmr.msra.gmra.mxu2 %v303_v30  ;;  %v728_v30 = vld [vmem:[%s1580_s2 + $0x138] sm:$0xff] }
  0xad   : > { %738 = vmatpush.msrb.mxu2 %v735_v13  ;;  %v821_v13 = vld [vmem:[%s1580_s2 + $0x1c8] sm:$0xff] }
  0xae   : > { %v463_v39 = vpop.f32.mrf.mxu2  ;;  %v1325_v5 = vpop.f32.mrf.mxu0 }
  0xaf   : > { %739 = vmatpush.msrb.mxu2 %v734_v14  ;;  %v550_v14 = vld [vmem:[%s1580_s2 + $0x48] sm:$0xff] }
  0xb0   : > { %v443_v38 = vpop.f32.mrf.mxu1 }
  0xb1   : > { %606 = vmatpush.msrb.mxu3 %v443_v38  ;;  %740 = vmatpush.msrb.mxu2 %v733_v16  ;;  %v614_v38 = vld [vmem:[%s1580_s2 + $0x98] sm:$0xff]  ;;  %v549_v16 = vld [vmem:[%s1580_s2 + $0x40] sm:$0xff] }
  0xb3   : > { %716 = vmatpush.msra.mxu3 %v463_v39  ;;  %741 = vmatpush.msrb.mxu2 %v732_v19  ;;  %v613_v39 = vld [vmem:[%s1580_s2 + $0x90] sm:$0xff]  ;;  %v548_v19 = vld [vmem:[%s1580_s2 + $0x38] sm:$0xff] }
  0xb5   : > { %742 = vmatpush.msrb.mxu2 %v731_v21  ;;  %v547_v21 = vld [vmem:[%s1580_s2 + $0x30] sm:$0xff] }
  0xb6   : > { %v343_v8 = vpop.f32.mrf.mxu0 }
  0xb7   : > { %501 = vmatpush.xpose.msra.mxu0 %v343_v8  ;;  %743 = vmatpush.msrb.mxu2 %v730_v23  ;;  %v553_v8 = vld [vmem:[%s1580_s2 + $0x60] sm:$0xff]  ;;  %v546_v23 = vld [vmem:[%s1580_s2 + $0x28] sm:$0xff] }
  0xb9   : > { %744 = vmatpush.msrb.mxu2 %v729_v26 }
  0xba   : > { %502 = vmatmul.f32.vlgmr.msra.gmra.mxu0 %v263_v2  ;;  %v556_v2 = vld [vmem:[%s1580_s2 + $0x78] sm:$0xff] }
  0xbb   : > { %627 = vmatpush.msrb.mxu0 %v626_v10  ;;  %745 = vmatpush.msrb.mxu2 %v728_v30  ;;  %v823_v10 = vld [vmem:[%s1580_s2 + $0x1d8] sm:$0xff] }
  0xbc   : > { %v544_v30 = vld [vmem:[%s1580_s2 + $0x18] sm:$0xff] }
  0xbd   : > { %628 = vmatpush.msrb.mxu0 %v625_v11  ;;  %746 = vmatpush.msrb.mxu2 %v727_v32  ;;  %v552_v11 = vld [vmem:[%s1580_s2 + $0x58] sm:$0xff]  ;;  %v543_v32 = vld [vmem:[%s1580_s2 + $0x10] sm:$0xff] }
  0xbf   : > { %629 = vmatpush.msrb.mxu0 %v624_v9  ;;  %747 = vmatpush.msrb.mxu2 %v726_v41  ;;  %v551_v9 = vld [vmem:[%s1580_s2 + $0x50] sm:$0xff] }
  0xc1   : > { %630 = vmatpush.msrb.mxu0 %v623_v15  ;;  %v820_v15 = vld [vmem:[%s1580_s2 + $0x1c0] sm:$0xff] }
  0xc3   : > { %631 = vmatpush.msrb.mxu0 %v622_v18  ;;  %v819_v18 = vld [vmem:[%s1580_s2 + $0x1b8] sm:$0xff] }
  0xc5   : > { %632 = vmatpush.msrb.mxu0 %v621_v20  ;;  %v818_v20 = vld [vmem:[%s1580_s2 + $0x1b0] sm:$0xff] }
  0xc7   : > { %633 = vmatpush.msrb.mxu0 %v620_v22  ;;  %v817_v22 = vld [vmem:[%s1580_s2 + $0x1a8] sm:$0xff] }
  0xc9   : > { %634 = vmatpush.msrb.mxu0 %v619_v24  ;;  %v816_v24 = vld [vmem:[%s1580_s2 + $0x1a0] sm:$0xff] }
  0xcb   : > { %635 = vmatpush.msrb.mxu0 %v618_v29  ;;  %v815_v29 = vld [vmem:[%s1580_s2 + $0x198] sm:$0xff] }
  0xcd   : > { %636 = vmatpush.msrb.mxu0 %v617_v31  ;;  %v814_v31 = vld [vmem:[%s1580_s2 + $0x190] sm:$0xff] }
  0xcf   : > { %637 = vmatpush.msrb.mxu0 %v616_v33  ;;  %v813_v33 = vld [vmem:[%s1580_s2 + $0x188] sm:$0xff] }
  0xd1   : > { %638 = vmatpush.msrb.mxu0 %v615_v34  ;;  %v542_v34 = vld [vmem:[%s1580_s2 + $0x8] sm:$0xff] }
  0xd3   : > { %639 = vmatpush.msrb.mxu0 %v614_v38  ;;  %v541_v38 = vld [vmem:[%s1580_s2] sm:$0xff] }
  0xd5   : > { %640 = vmatpush.msrb.mxu0 %v613_v39 }
  0xd7   : > { %641 = vmatpush.msrb.mxu0 %v612_v40 }
 0x127   : > { %v574_v42 = vpop.f32.mrf.mxu2 }
 0x128   : > { %v577_v43 = vsel %vm506_vm1, %v574_v42, -inf }
 0x129   : > { %578 = vmax.xlane.f32.xlu0 %v577_v43  ;;  %v611_v43 = vld [vmem:[%s1580_s2 + $0x80] sm:$0xff] }
 0x12a   : > { %642 = vmatpush.msrb.mxu0 %v611_v43 }
 0x12f   : > { %v684_v44 = vpop.f32.mrf.mxu2 }
 0x130   : > { %v687_v45 = vsel %vm506_vm1, %v684_v44, -inf }
 0x131   : > { %688 = vmax.xlane.f32.xlu0 %v687_v45  ;;  %v724_v45 = vld [vmem:[%s1580_s2 + $0x118] sm:$0xff] }
 0x19c   : > { %v579_v56 = vpop.xlane.xlu0 %578 }
 0x19d   : > { %v580_v57 = vsub.f32 %v574_v42, %v579_v56  ;;  %v423_v42 = vpop.f32.mrf.mxu0 }
 0x19e   : > { %536 = vmatpush.msra.mxu1 %v423_v42 }
 0x19f   : > { %v581_v58 = vmul.f32 1.442695, %v580_v57 }
 0x1a0   : > { %647 = vmatpush.msrb.mxu1 %v556_v2 }
 0x1a1   : > { %996 = vpow2.f32 %v581_v58 }
 0x1a2   : > { %648 = vmatpush.msrb.mxu1 %v555_v4 }
 0x1a4   : > { %v689_v59 = vpop.xlane.xlu0 %688  ;;  %649 = vmatpush.msrb.mxu1 %v554_v6 }
 0x1a5   : > { %v690_v60 = vsub.f32 %v684_v44, %v689_v59  ;;  %v725_v44 = vld [vmem:[%s1580_s2 + $0x120] sm:$0xff]  ;;  %v503_v53 = vpop.f32.mrf.mxu0 }
 0x1a6   : > { %748 = vmatpush.msrb.mxu2 %v725_v44  ;;  %v507_v54 = vsel %vm506_vm1, %v503_v53, -inf  ;;  %650 = vmatpush.msrb.mxu1 %v553_v8 }
 0x1a7   : > { %v997_v61 = vpop.eup %996  ;;  %v691_v62 = vmul.f32 1.442695, %v690_v60 }
 0x1a8   : > { %v583_v63 = vsel %vm506_vm1, %v997_v61, 0.0  ;;  %749 = vmatpush.msrb.mxu2 %v724_v45  ;;  %651 = vmatpush.msrb.mxu1 %v552_v11 }
 0x1a9   : > { %998 = vpow2.f32 %v691_v62  ;;  %584 = vadd.xlane.f32.xlu1 %v583_v63 }
 0x1aa   : > { %750 = vmatpush.msrb.mxu2 %v723_v46  ;;  %652 = vmatpush.msrb.mxu1 %v551_v9  ;;  %v995_v46 = vld [vmem:[%s1581_s3] ss:$0 sm:$0xff] }
 0x1ac   : > { %751 = vmatpush.msrb.mxu2 %v722_v47  ;;  %653 = vmatpush.msrb.mxu1 %v550_v14 }
 0x1ae   : > { %752 = vmatpush.msrb.mxu2 %v721_v48  ;;  %654 = vmatpush.msrb.mxu1 %v549_v16 }
 0x1af   : > { %v1315_v0 = vpop.eup %998 }
 0x1b0   : > { %v693_v1 = vsel %vm506_vm1, %v1315_v0, 0.0  ;;  %655 = vmatpush.msrb.mxu1 %v548_v19 }
 0x1b1   : > { %694 = vadd.xlane.f32.xlu1 %v693_v1  ;;  %v827_v1 = vld [vmem:[%s1580_s2 + $0x1f8] sm:$0xff] }
 0x1b2   : > { %656 = vmatpush.msrb.mxu1 %v547_v21 }
 0x1b4   : > { %657 = vmatpush.msrb.mxu1 %v546_v23 }
 0x21c   : > { %v585_v17 = vpop.xlane.xlu1 %584 }
 0x21d   : > { %1000 = vrcp.f32 %v585_v17 }
 0x223   : > { %v1001_v25 = vpop.eup %1000 }
 0x224   : > { %v695_v27 = vpop.xlane.xlu1 %694  ;;  %v587_v28 = vmul.f32 %v1001_v25, %v997_v61  ;;  %v545_v25 = vld [vmem:[%s1580_s2 + $0x20] sm:$0xff] }
 0x225   : > { %1002 = vrcp.f32 %v695_v27  ;;  %658 = vmatpush.msrb.mxu1 %v545_v25 }
 0x226   : > { %949 = vmatmul.msk.f32.vlgmr.msrb.gmra.mxu3 %vm506_vm1, %v587_v28 }
 0x227   : > { %773 = vmatpush.xpose.msrb.mxu3 %v1268_v37  ;;  %v483_v37 = vpop.f32.mrf.mxu3  ;;  %659 = vmatpush.msrb.mxu1 %v544_v30 }
 0x229   : > { %660 = vmatpush.msrb.mxu1 %v543_v32 }
 0x22b   : > { %v1003_v35 = vpop.eup %1002  ;;  %661 = vmatpush.msrb.mxu1 %v542_v34 }
 0x22c   : > { %v697_v36 = vmul.f32 %v1003_v35, %v1315_v0 }
 0x22d   : > { %662 = vmatpush.msrb.mxu1 %v541_v38 }
 0x22e   : > { %950 = vmatmul.msk.f32.vlgmr.msra.gmra.mxu3 %vm506_vm1, %v697_v36 }
 0x22f   : > { %807 = vmatpush.msra.mxu3 %v483_v37  ;;  %v812_v37 = vld [vmem:[%s1580_s2 + $0x180] sm:$0xff] }
 0x236   : > { %774 = vmatmul.f32.vlgmr.msrb.gmra.mxu3 %v1325_v5  ;;  %v825_v5 = vld [vmem:[%s1580_s2 + $0x1e8] sm:$0xff] }
 0x237   : > { %828 = vmatpush.msrb.mxu3 %v827_v1 }
 0x239   : > { %829 = vmatpush.msrb.mxu3 %v826_v3 }
 0x23b   : > { %830 = vmatpush.msrb.mxu3 %v825_v5 }
 0x23d   : > { %831 = vmatpush.msrb.mxu3 %v824_v7 }
 0x23f   : > { %832 = vmatpush.msrb.mxu3 %v823_v10 }
 0x241   : > { %833 = vmatpush.msrb.mxu3 %v822_v12 }
 0x243   : > { %834 = vmatpush.msrb.mxu3 %v821_v13 }
 0x245   : > { %835 = vmatpush.msrb.mxu3 %v820_v15 }
 0x247   : > { %836 = vmatpush.msrb.mxu3 %v819_v18 }
 0x249   : > { %837 = vmatpush.msrb.mxu3 %v818_v20 }
 0x24b   : > { %838 = vmatpush.msrb.mxu3 %v817_v22 }
 0x24d   : > { %839 = vmatpush.msrb.mxu3 %v816_v24 }
 0x24f   : > { %840 = vmatpush.msrb.mxu3 %v815_v29 }
 0x251   : > { %841 = vmatpush.msrb.mxu3 %v814_v31 }
 0x253   : > { %842 = vmatpush.msrb.mxu3 %v813_v33 }
 0x255   : > { %843 = vmatpush.msrb.mxu3 %v812_v37 }
 0x2a9   : > { %v608_v49 = vpop.f32.mrf.mxu3 }
 0x2aa   : > { %643 = vmatmul.f32.vlgmr.msrb.gmra.mxu0 %v608_v49 }
 0x2b1   : > { %v718_v50 = vpop.f32.mrf.mxu3 }
 0x2b2   : > { %753 = vmatmul.f32.vlgmr.msrb.gmra.mxu2 %v718_v50 }
 0x2b9   : > { %v775_v51 = vpop.f32.mrf.mxu3 }
 0x2ba   : > { %v778_v52 = vsel %vm506_vm1, %v775_v51, -inf }
 0x2bb   : > { %779 = vmax.xlane.f32.xlu2 %v778_v52 }
 0x2c3   : > { %508 = vmax.xlane.f32.xlu2 %v507_v54 }
 0x327   : > { %v644_v41 = vpop.f32.mrf.mxu0 }
 0x32e   : > { %v780_v55 = vpop.xlane.xlu2 %779 }
 0x32f   : > { %v781_v56 = vsub.f32 %v775_v51, %v780_v55 }
 0x331   : > { %v782_v57 = vmul.f32 1.442695, %v781_v56 }
 0x333   : > { %1004 = vpow2.f32 %v782_v57 }
 0x335   : > { %v754_v44 = vpop.f32.mrf.mxu2 }
 0x336   : > { %v509_v58 = vpop.xlane.xlu2 %508 }
 0x337   : > { %v510_v59 = vsub.f32 %v503_v53, %v509_v58 }
 0x339   : > { %v1005_v60 = vpop.eup %1004  ;;  %v511_v61 = vmul.f32 1.442695, %v510_v59 }
 0x33a   : > { %v784_v62 = vsel %vm506_vm1, %v1005_v60, 0.0 }
 0x33b   : > { %1006 = vpow2.f32 %v511_v61  ;;  %785 = vadd.xlane.f32.xlu0 %v784_v62 }
 0x341   : > { %v1439_v63 = vpop.eup %1006 }
 0x342   : > { %v513_v0 = vsel %vm506_vm1, %v1439_v63, 0.0 }
 0x343   : > { %514 = vadd.xlane.f32.xlu1 %v513_v0 }
 0x3ae   : > { %v786_v17 = vpop.xlane.xlu0 %785 }
 0x3af   : > { %1008 = vrcp.f32 %v786_v17 }
 0x3b5   : > { %v1009_v26 = vpop.eup %1008 }
 0x3b6   : > { %v788_v27 = vmul.f32 %v1009_v26, %v1005_v60  ;;  %v515_v28 = vpop.xlane.xlu1 %514 }
 0x3b7   : > { %1010 = vrcp.f32 %v515_v28 }
 0x3b8   : > { %951 = vmatmul.msk.f32.vlgmr.msra.gmra.mxu3 %vm506_vm1, %v788_v27 }
 0x3bd   : > { %v1011_v35 = vpop.eup %1010 }
 0x3be   : > { %v517_v36 = vmul.f32 %v1011_v35, %v1439_v63 }
 0x3c0   : > { %948 = vmatmul.msk.f32.vlgmr.msra.gmra.mxu1 %vm506_vm1, %v517_v36 }
 0x43b   : > { %v809_v39 = vpop.f32.mrf.mxu3 }
 0x43c   : > { %844 = vmatmul.f32.vlgmr.msrb.gmra.mxu3 %v809_v39 }
 0x43d   : > { %v538_v40 = vpop.f32.mrf.mxu1 }
 0x43e   : > { %663 = vmatmul.f32.vlgmr.msrb.gmra.mxu1 %v538_v40 }
 0x4bb   : > { %v664_v42 = vpop.f32.mrf.mxu1 }
 0x4bc   : > { %v665_v43 = vadd.f32 %v664_v42, %v644_v41 }
 0x4be   : > { %v757_v45 = vadd.f32 %v754_v44, %v665_v43 }
 0x4bf   : > { %v845_v47 = vpop.f32.mrf.mxu3 }
 0x4c0   : > { %v848_v48 = vadd.f32 %v845_v47, %v757_v45 }
 0x4c2   : > { %v853_v49 = vadd.f32 %v995_v46, %v848_v48 }
 0x4c4   : > { %854 = vst.msk [vmem:[%s188_s23] sm:$0xff] %vm242_vm0, %v853_v49 }
 0x4c5   : > { %1039 = shalt.err (!%p1036_p3)
}
 0x4c6   : > { %956 = dma.vmem_to_hbm [thread:$0]  (%p1139_p5), %s869_s27, 128, %s871_s28, %s856_s19  }
 0x4c7 PF: > { %p962_p4 = scmp.ge.s32.totalorder %s1074_s18, 2  ;;  %s882_s9 = sand.u32 1, %s1062_s15  }
 0x4c8   : > { %s883_s11 = scalar_lea.sflag [#allocation3], %s882_s9 }
 0x4c9   : > { %p959_p7 = pnand %p962_p4, %p1143_p6 }
 0x4cb   : > { %p960_p8 = pneg %p959_p7 }
 0x4cd   : > { %1057 = dma.done.wait (%p960_p8), %s883_s11, 128  }
 0x4ce   : > { %1059 = vsyncadd (%p960_p8), %s883_s11, 4294967168  ;;  %p14_p9 = scmp.ge.s32.totalorder %s1126_s21, 4   ;;  %s1585_s15 = smov %s1066_s16 }
 0x4cf   : > { %s1586_s16 = smov %s1070_s17  ;;  %s1587_s17 = smov %s1137_s24 }
 0x4d0   : > { %s1588_s18 = smov %s1126_s21  ;;  %16 = sbr.rel (!%p14_p9) target bundleno = 3 (0x3), region = 71 }
 0x4d5   :  { %889 = vsyncpa [#allocation3], 1 }
 0x4d6   :  { %891 = vsyncpa [#allocation3 + $0x1], 1 }

</bundles_post_ra>
